<compile_context>
chip_gen: v7x
topology: tpu7x:2x2x1
jax: 0.10.0
libtpu: 0.0.40
codegen_flags: <defaults>
</compile_context>

<pallas_src>
import functools

import jax
import jax.numpy as jnp
from jax.experimental import pallas as pl
from jax.experimental.pallas import tpu as pltpu


def _round_up(x, m):
    return (x + m - 1) // m * m


def mlp_action_kernel(zt_ref, w1_ref, w2_ref, w3_ref, w4_ref, w5_ref, bias_ref,
                      out_ref, *, num_bins):
    """Five Linear(+ReLU) layers + grouped softmax for one batch tile, in VMEM."""
    K = num_bins
    N = out_ref.shape[-1]            # input_dim * num_bins (lane-dense width)

    def dense(x, w_ref, bias_row):
        # bf16 operands on the MXU, f32 accumulation; bias add in f32 on the VPU.
        y = jnp.dot(x.astype(jnp.bfloat16), w_ref[...],
                    preferred_element_type=jnp.float32)
        return y + bias_ref[bias_row, : y.shape[-1]]   # row select: free sublane pick

    h = jnp.maximum(dense(zt_ref[...], w1_ref, 0), 0.0)
    h = jnp.maximum(dense(h, w2_ref, 1), 0.0)
    h = jnp.maximum(dense(h, w3_ref, 2), 0.0)
    h = jnp.maximum(dense(h, w4_ref, 3), 0.0)
    logits = dense(h, w5_ref, 4)                       # (tb, N) float32

    # ---- grouped softmax over contiguous groups of K lanes ------------------
    # Full-row max: one XLU reduce + broadcast.  Any per-row constant cancels in
    # the per-group softmax; exp arguments are <= 0 so no overflow.
    rmax = jnp.max(logits, axis=-1, keepdims=True)
    e = jnp.exp(logits - rmax)                         # single EUP pass

    # Per-group sums via an XOR-butterfly over the lane axis: log2(K) steps of
    # (2 rolls + select + add).  Exact f32, stays on XLU/VPU, no MXU involved.
    # The select mask is derived from a rolled lane-iota, so it is correct
    # regardless of pltpu.roll's shift-direction convention.
    lane = jax.lax.broadcasted_iota(jnp.int32, (1, N), 1)
    denom = e
    d = 1
    while d < K:
        ra = pltpu.roll(denom, d, axis=1)
        rb = pltpu.roll(denom, N - d, axis=1)          # the opposite direction
        src = pltpu.roll(lane, d, axis=1)              # which lane `ra` brought
        take_a = src == (lane ^ d)                     # is it the XOR partner?
        denom = denom + jnp.where(take_a, ra, rb)
        d *= 2

    # Guard against a fully-underflowed group (group max ~88+ below row max);
    # prevents a divide-by-zero NaN in that pathological case.
    denom = jnp.maximum(denom, 1e-30)

    # Single unmasked lane-dense store.
    out_ref[...] = (e / denom).astype(out_ref.dtype)


def prepare_params(params):
    """One-time preprocessing (call at model-load time, NOT per forward call).

    params: list of (weight, bias) in PyTorch layout (out_features, in_features).
    Returns (weights_bf16, bias_pack):
      weights_bf16: tuple of (in, out) bf16 arrays (native MXU dtype),
      bias_pack:    (5, 128)-padded f32 buffer, one bias per row.
    """
    ws = tuple(jnp.asarray(w, jnp.float32).T.astype(jnp.bfloat16) for w, _ in params)
    bs = [jnp.asarray(b, jnp.float32).reshape(-1) for _, b in params]
    width = _round_up(max(b.shape[0] for b in bs), 128)
    bias_pack = jnp.stack([jnp.pad(b, (0, width - b.shape[0])) for b in bs])
    return ws, bias_pack


def mlp_action_forward(zt, ws, bias_pack, *, input_dim, num_bins,
                       tile_b=1024, out_dtype=jnp.float32):
    """Forward pass.  ws/bias_pack come from prepare_params()."""
    w1, w2, w3, w4, w5 = ws
    batch = zt.shape[0]
    hidden_dim = w1.shape[1]
    n_out = w5.shape[1]
    assert n_out == input_dim * num_bins
    assert num_bins & (num_bins - 1) == 0, "num_bins must be a power of two"
    assert n_out % 128 == 0, "input_dim * num_bins must be lane-aligned (x128)"

    # Batch tiling: tb is a multiple of 16 (bf16 sublane packing).  Recommended
    # tile_b: 2048-4096 on v5e/v6e, <=2048 on v7x (64 MiB physical VMEM).
    tb = max(16, min(_round_up(batch, 16), _round_up(tile_b, 16)))
    padded = _round_up(batch, tb)
    if padded != batch:
        zt = jnp.pad(zt, ((0, padded - batch), (0, 0)))
    grid = (padded // tb,)

    const = lambda i: (0, 0)   # weights / biases stay VMEM-resident across steps

    out_itemsize = jnp.dtype(out_dtype).itemsize
    w_bytes = sum(int(w.size) * w.dtype.itemsize for w in ws)
    bias_bytes = int(bias_pack.size) * 4
    # Per-tile VMEM footprint (zt tile is lane-padded 8 -> 128), double-buffered,
    # plus slack for in-kernel f32 temporaries; clamped to [32 MiB, 48 MiB].
    est_vmem = (2 * tb * 128 * 4
                + 2 * tb * n_out * out_itemsize
                + 2 * w_bytes + 2 * bias_bytes
                + 6 * tb * n_out * 4)
    vmem_limit = int(min(max(est_vmem, 32 * 2**20), 48 * 2**20))

    cost = pl.CostEstimate(
        flops=int(2 * padded * (input_dim * hidden_dim
                                + 3 * hidden_dim * hidden_dim
                                + hidden_dim * n_out)),
        transcendentals=int(padded * n_out),
        bytes_accessed=int(padded * (input_dim * 4 + n_out * out_itemsize)
                           + w_bytes + bias_bytes),
    )

    out = pl.pallas_call(
        functools.partial(mlp_action_kernel, num_bins=num_bins),
        out_shape=jax.ShapeDtypeStruct((padded, n_out), out_dtype),
        grid=grid,
        in_specs=[
            pl.BlockSpec((tb, input_dim), lambda i: (i, 0)),   # zt (batch-tiled)
            pl.BlockSpec(w1.shape, const),                     # w1
            pl.BlockSpec(w2.shape, const),                     # w2
            pl.BlockSpec(w3.shape, const),                     # w3
            pl.BlockSpec(w4.shape, const),                     # w4
            pl.BlockSpec(w5.shape, const),                     # w5
            pl.BlockSpec(bias_pack.shape, const),              # packed biases
        ],
        out_specs=pl.BlockSpec((tb, n_out), lambda i: (i, 0)),
        compiler_params=pltpu.CompilerParams(
            dimension_semantics=("parallel",),
            vmem_limit_bytes=vmem_limit,
        ),
        cost_estimate=cost,
    )(zt, w1, w2, w3, w4, w5, bias_pack)

    # Lane-dense kernel output; the (batch, input_dim, num_bins) view is free.
    return out[:batch].reshape(batch, input_dim, num_bins)


def mlp_action_predictor(zt, params, *, input_dim, num_bins,
                         tile_b=1024, out_dtype=jnp.float32):
    """Convenience wrapper: prep + forward (prefer prepare_params once + forward)."""
    ws, bias_pack = prepare_params(params)
    return mlp_action_forward(zt, ws, bias_pack, input_dim=input_dim,
                              num_bins=num_bins, tile_b=tile_b,
                              out_dtype=out_dtype)


def _reference(zt, params, *, input_dim, num_bins):
    """Pure-JAX reference mirroring the kernel's bf16-matmul / f32-softmax math."""
    x = zt
    n = len(params)
    for li, (w, b) in enumerate(params):
        wt = jnp.asarray(w, jnp.float32).T.astype(jnp.bfloat16)
        x = jnp.dot(x.astype(jnp.bfloat16), wt,
                    preferred_element_type=jnp.float32) + jnp.asarray(b, jnp.float32)
        if li < n - 1:
            x = jnp.maximum(x, 0.0)
    logits = x.reshape(zt.shape[0], input_dim, num_bins)
    return jax.nn.softmax(logits, axis=-1)


def _init_linear(key, out_features, in_features):
    """Deterministic init mimicking torch.nn.Linear (uniform +-1/sqrt(fan_in))."""
    kw, kb = jax.random.split(key)
    bound = 1.0 / jnp.sqrt(jnp.float32(in_features))
    w = jax.random.uniform(kw, (out_features, in_features), jnp.float32,
                           minval=-bound, maxval=bound)
    b = jax.random.uniform(kb, (out_features,), jnp.float32,
                           minval=-bound, maxval=bound)
    return w, b


if __name__ == "__main__":
    # Small shapes consistent with the module; batch=40 (not a tile multiple)
    # exercises padding and a 3-step batch grid with tile_b=16.
    batch = 40
    input_dim = 8
    hidden_dim = 32
    num_bins = 16
    output_dim = input_dim * num_bins   # 128 -> lane-dense kernel output

    root = jax.random.PRNGKey(0)
    keys = jax.random.split(root, 6)
    params = [
        _init_linear(keys[0], hidden_dim, input_dim),    # fc1
        _init_linear(keys[1], hidden_dim, hidden_dim),   # fc2
        _init_linear(keys[2], hidden_dim, hidden_dim),   # fc3
        _init_linear(keys[3], hidden_dim, hidden_dim),   # fc4
        _init_linear(keys[4], output_dim, hidden_dim),   # fc5
    ]
    zt = jax.random.normal(keys[5], (batch, input_dim), jnp.float32)

    # One-time weight prep (outside jit, as per the perf review).
    ws, bias_pack = prepare_params(params)

    fn = jax.jit(functools.partial(mlp_action_forward,
                                   input_dim=input_dim, num_bins=num_bins,
                                   tile_b=16))   # tiny tile to exercise the grid
    h_hat = fn(zt, ws, bias_pack)
    jax.block_until_ready(h_hat)

    # Sanity: shape, finiteness, softmax rows sum to ~1, and match a pure-JAX ref.
    assert h_hat.shape == (batch, input_dim, num_bins)
    assert bool(jnp.all(jnp.isfinite(h_hat)))
    row_sums = jnp.sum(h_hat, axis=-1)
    assert bool(jnp.all(jnp.abs(row_sums - 1.0) < 1e-3)), \
        float(jnp.max(jnp.abs(row_sums - 1.0)))
    ref = _reference(zt, params, input_dim=input_dim, num_bins=num_bins)
    assert bool(jnp.all(jnp.abs(h_hat - ref) < 2e-3)), \
        float(jnp.max(jnp.abs(h_hat - ref)))

    print("KERNEL_OK")
</pallas_src>

<mosaic_0001>
module attributes {stable_mosaic.version = 11 : i64} {
  func.func @mlp_action_kernel(%arg0: i32, %arg1: memref<16x8xf32, #tpu.memory_space<vmem>>, %arg2: memref<8x32xbf16, #tpu.memory_space<vmem>>, %arg3: memref<32x32xbf16, #tpu.memory_space<vmem>>, %arg4: memref<32x32xbf16, #tpu.memory_space<vmem>>, %arg5: memref<32x32xbf16, #tpu.memory_space<vmem>>, %arg6: memref<32x128xbf16, #tpu.memory_space<vmem>>, %arg7: memref<5x128xf32, #tpu.memory_space<vmem>>, %arg8: memref<16x128xf32, #tpu.memory_space<vmem>>) attributes {dimension_semantics = [#tpu.dimension_semantics<parallel>], iteration_bounds = array<i64: 3>, scalar_prefetch = 0 : i64, scratch_operands = 0 : i64, tpu.core_type = #tpu.core_type<tc>, window_params = [{transform_indices = @transform_0, window_bounds = array<i64: 16, 8>}, {pipeline_mode = #tpu.pipeline_mode<synchronous>, transform_indices = @transform_1, window_bounds = array<i64: 8, 32>}, {pipeline_mode = #tpu.pipeline_mode<synchronous>, transform_indices = @transform_2, window_bounds = array<i64: 32, 32>}, {pipeline_mode = #tpu.pipeline_mode<synchronous>, transform_indices = @transform_3, window_bounds = array<i64: 32, 32>}, {pipeline_mode = #tpu.pipeline_mode<synchronous>, transform_indices = @transform_4, window_bounds = array<i64: 32, 32>}, {pipeline_mode = #tpu.pipeline_mode<synchronous>, transform_indices = @transform_5, window_bounds = array<i64: 32, 128>}, {pipeline_mode = #tpu.pipeline_mode<synchronous>, transform_indices = @transform_6, window_bounds = array<i64: 5, 128>}, {transform_indices = @transform_7, window_bounds = array<i64: 16, 128>}]} {
    %c0 = arith.constant 0 : index
    %c0_0 = arith.constant 0 : index
    %0 = vector.load %arg1[%c0, %c0_0] : memref<16x8xf32, #tpu.memory_space<vmem>>, vector<16x8xf32>
    %1 = arith.truncf %0 : vector<16x8xf32> to vector<16x8xbf16>
    %c0_1 = arith.constant 0 : index
    %c0_2 = arith.constant 0 : index
    %2 = vector.load %arg2[%c0_1, %c0_2] : memref<8x32xbf16, #tpu.memory_space<vmem>>, vector<8x32xbf16>
    %cst = arith.constant dense<0.000000e+00> : vector<16x32xf32>
    %3 = tpu.matmul %1, %2, %cst {dimension_numbers = #tpu.dot_dimension_numbers<[1], [0], [0], [1], [0, 0, 1, 1], [], []>} : vector<16x8xbf16>, vector<8x32xbf16>, vector<16x32xf32> -> vector<16x32xf32>
    %c0_3 = arith.constant 0 : index
    %c0_4 = arith.constant 0 : index
    %4 = vector.load %arg7[%c0_3, %c0_4] : memref<5x128xf32, #tpu.memory_space<vmem>>, vector<1x32xf32>
    %5 = vector.shape_cast %4 : vector<1x32xf32> to vector<32xf32>
    %6 = vector.shape_cast %5 : vector<32xf32> to vector<1x32xf32>
    %7 = vector.broadcast %6 : vector<1x32xf32> to vector<16x32xf32>
    %8 = arith.addf %3, %7 : vector<16x32xf32>
    %cst_5 = arith.constant 0.000000e+00 : f32
    %9 = vector.broadcast %cst_5 : f32 to vector<16x32xf32>
    %10 = arith.maximumf %8, %9 : vector<16x32xf32>
    %11 = arith.truncf %10 : vector<16x32xf32> to vector<16x32xbf16>
    %c0_6 = arith.constant 0 : index
    %c0_7 = arith.constant 0 : index
    %12 = vector.load %arg3[%c0_6, %c0_7] : memref<32x32xbf16, #tpu.memory_space<vmem>>, vector<32x32xbf16>
    %cst_8 = arith.constant dense<0.000000e+00> : vector<16x32xf32>
    %13 = tpu.matmul %11, %12, %cst_8 {dimension_numbers = #tpu.dot_dimension_numbers<[1], [0], [0], [1], [0, 0, 1, 1], [], []>} : vector<16x32xbf16>, vector<32x32xbf16>, vector<16x32xf32> -> vector<16x32xf32>
    %c1 = arith.constant 1 : index
    %c0_9 = arith.constant 0 : index
    %14 = vector.load %arg7[%c1, %c0_9] : memref<5x128xf32, #tpu.memory_space<vmem>>, vector<1x32xf32>
    %15 = vector.shape_cast %14 : vector<1x32xf32> to vector<32xf32>
    %16 = vector.shape_cast %15 : vector<32xf32> to vector<1x32xf32>
    %17 = vector.broadcast %16 : vector<1x32xf32> to vector<16x32xf32>
    %18 = arith.addf %13, %17 : vector<16x32xf32>
    %cst_10 = arith.constant 0.000000e+00 : f32
    %19 = vector.broadcast %cst_10 : f32 to vector<16x32xf32>
    %20 = arith.maximumf %18, %19 : vector<16x32xf32>
    %21 = arith.truncf %20 : vector<16x32xf32> to vector<16x32xbf16>
    %c0_11 = arith.constant 0 : index
    %c0_12 = arith.constant 0 : index
    %22 = vector.load %arg4[%c0_11, %c0_12] : memref<32x32xbf16, #tpu.memory_space<vmem>>, vector<32x32xbf16>
    %cst_13 = arith.constant dense<0.000000e+00> : vector<16x32xf32>
    %23 = tpu.matmul %21, %22, %cst_13 {dimension_numbers = #tpu.dot_dimension_numbers<[1], [0], [0], [1], [0, 0, 1, 1], [], []>} : vector<16x32xbf16>, vector<32x32xbf16>, vector<16x32xf32> -> vector<16x32xf32>
    %c2 = arith.constant 2 : index
    %c0_14 = arith.constant 0 : index
    %24 = vector.load %arg7[%c2, %c0_14] : memref<5x128xf32, #tpu.memory_space<vmem>>, vector<1x32xf32>
    %25 = vector.shape_cast %24 : vector<1x32xf32> to vector<32xf32>
    %26 = vector.shape_cast %25 : vector<32xf32> to vector<1x32xf32>
    %27 = vector.broadcast %26 : vector<1x32xf32> to vector<16x32xf32>
    %28 = arith.addf %23, %27 : vector<16x32xf32>
    %cst_15 = arith.constant 0.000000e+00 : f32
    %29 = vector.broadcast %cst_15 : f32 to vector<16x32xf32>
    %30 = arith.maximumf %28, %29 : vector<16x32xf32>
    %31 = arith.truncf %30 : vector<16x32xf32> to vector<16x32xbf16>
    %c0_16 = arith.constant 0 : index
    %c0_17 = arith.constant 0 : index
    %32 = vector.load %arg5[%c0_16, %c0_17] : memref<32x32xbf16, #tpu.memory_space<vmem>>, vector<32x32xbf16>
    %cst_18 = arith.constant dense<0.000000e+00> : vector<16x32xf32>
    %33 = tpu.matmul %31, %32, %cst_18 {dimension_numbers = #tpu.dot_dimension_numbers<[1], [0], [0], [1], [0, 0, 1, 1], [], []>} : vector<16x32xbf16>, vector<32x32xbf16>, vector<16x32xf32> -> vector<16x32xf32>
    %c3 = arith.constant 3 : index
    %c0_19 = arith.constant 0 : index
    %34 = vector.load %arg7[%c3, %c0_19] : memref<5x128xf32, #tpu.memory_space<vmem>>, vector<1x32xf32>
    %35 = vector.shape_cast %34 : vector<1x32xf32> to vector<32xf32>
    %36 = vector.shape_cast %35 : vector<32xf32> to vector<1x32xf32>
    %37 = vector.broadcast %36 : vector<1x32xf32> to vector<16x32xf32>
    %38 = arith.addf %33, %37 : vector<16x32xf32>
    %cst_20 = arith.constant 0.000000e+00 : f32
    %39 = vector.broadcast %cst_20 : f32 to vector<16x32xf32>
    %40 = arith.maximumf %38, %39 : vector<16x32xf32>
    %41 = arith.truncf %40 : vector<16x32xf32> to vector<16x32xbf16>
    %c0_21 = arith.constant 0 : index
    %c0_22 = arith.constant 0 : index
    %42 = vector.load %arg6[%c0_21, %c0_22] : memref<32x128xbf16, #tpu.memory_space<vmem>>, vector<32x128xbf16>
    %cst_23 = arith.constant dense<0.000000e+00> : vector<16x128xf32>
    %43 = tpu.matmul %41, %42, %cst_23 {dimension_numbers = #tpu.dot_dimension_numbers<[1], [0], [0], [1], [0, 0, 1, 1], [], []>} : vector<16x32xbf16>, vector<32x128xbf16>, vector<16x128xf32> -> vector<16x128xf32>
    %c4 = arith.constant 4 : index
    %c0_24 = arith.constant 0 : index
    %44 = vector.load %arg7[%c4, %c0_24] : memref<5x128xf32, #tpu.memory_space<vmem>>, vector<1x128xf32>
    %45 = vector.shape_cast %44 : vector<1x128xf32> to vector<128xf32>
    %46 = vector.shape_cast %45 : vector<128xf32> to vector<1x128xf32>
    %47 = vector.broadcast %46 : vector<1x128xf32> to vector<16x128xf32>
    %48 = arith.addf %43, %47 : vector<16x128xf32>
    %cst_25 = arith.constant dense<0xFF800000> : vector<16xf32>
    %49 = vector.multi_reduction <maximumf>, %48, %cst_25 [1] : vector<16x128xf32> to vector<16xf32>
    %50 = vector.shape_cast %49 : vector<16xf32> to vector<16x1xf32>
    %51 = vector.broadcast %50 : vector<16x1xf32> to vector<16x128xf32>
    %52 = arith.subf %48, %51 : vector<16x128xf32>
    %53 = math.exp %52 : vector<16x128xf32>
    %54 = tpu.iota {dimensions = array<i32: 1>} : vector<1x128xi32>
    %c1_i32 = arith.constant 1 : i32
    %55 = tpu.dynamic_rotate %53 by %c1_i32 dim 1 : vector<16x128xf32>, i32 -> vector<16x128xf32>
    %c127_i32 = arith.constant 127 : i32
    %56 = tpu.dynamic_rotate %53 by %c127_i32 dim 1 : vector<16x128xf32>, i32 -> vector<16x128xf32>
    %c1_i32_26 = arith.constant 1 : i32
    %57 = tpu.dynamic_rotate %54 by %c1_i32_26 dim 1 : vector<1x128xi32>, i32 -> vector<1x128xi32>
    %c1_i32_27 = arith.constant 1 : i32
    %58 = vector.broadcast %c1_i32_27 : i32 to vector<1x128xi32>
    %59 = arith.xori %54, %58 : vector<1x128xi32>
    %60 = arith.cmpi eq, %57, %59 : vector<1x128xi32>
    %61 = vector.shape_cast %60 : vector<1x128xi1> to vector<1x128xi1>
    %62 = vector.broadcast %61 : vector<1x128xi1> to vector<16x128xi1>
    %63 = arith.select %62, %55, %56 : vector<16x128xi1>, vector<16x128xf32>
    %64 = arith.addf %53, %63 : vector<16x128xf32>
    %c2_i32 = arith.constant 2 : i32
    %65 = tpu.dynamic_rotate %64 by %c2_i32 dim 1 : vector<16x128xf32>, i32 -> vector<16x128xf32>
    %c126_i32 = arith.constant 126 : i32
    %66 = tpu.dynamic_rotate %64 by %c126_i32 dim 1 : vector<16x128xf32>, i32 -> vector<16x128xf32>
    %c2_i32_28 = arith.constant 2 : i32
    %67 = tpu.dynamic_rotate %54 by %c2_i32_28 dim 1 : vector<1x128xi32>, i32 -> vector<1x128xi32>
    %c2_i32_29 = arith.constant 2 : i32
    %68 = vector.broadcast %c2_i32_29 : i32 to vector<1x128xi32>
    %69 = arith.xori %54, %68 : vector<1x128xi32>
    %70 = arith.cmpi eq, %67, %69 : vector<1x128xi32>
    %71 = vector.shape_cast %70 : vector<1x128xi1> to vector<1x128xi1>
    %72 = vector.broadcast %71 : vector<1x128xi1> to vector<16x128xi1>
    %73 = arith.select %72, %65, %66 : vector<16x128xi1>, vector<16x128xf32>
    %74 = arith.addf %64, %73 : vector<16x128xf32>
    %c4_i32 = arith.constant 4 : i32
    %75 = tpu.dynamic_rotate %74 by %c4_i32 dim 1 : vector<16x128xf32>, i32 -> vector<16x128xf32>
    %c124_i32 = arith.constant 124 : i32
    %76 = tpu.dynamic_rotate %74 by %c124_i32 dim 1 : vector<16x128xf32>, i32 -> vector<16x128xf32>
    %c4_i32_30 = arith.constant 4 : i32
    %77 = tpu.dynamic_rotate %54 by %c4_i32_30 dim 1 : vector<1x128xi32>, i32 -> vector<1x128xi32>
    %c4_i32_31 = arith.constant 4 : i32
    %78 = vector.broadcast %c4_i32_31 : i32 to vector<1x128xi32>
    %79 = arith.xori %54, %78 : vector<1x128xi32>
    %80 = arith.cmpi eq, %77, %79 : vector<1x128xi32>
    %81 = vector.shape_cast %80 : vector<1x128xi1> to vector<1x128xi1>
    %82 = vector.broadcast %81 : vector<1x128xi1> to vector<16x128xi1>
    %83 = arith.select %82, %75, %76 : vector<16x128xi1>, vector<16x128xf32>
    %84 = arith.addf %74, %83 : vector<16x128xf32>
    %c8_i32 = arith.constant 8 : i32
    %85 = tpu.dynamic_rotate %84 by %c8_i32 dim 1 : vector<16x128xf32>, i32 -> vector<16x128xf32>
    %c120_i32 = arith.constant 120 : i32
    %86 = tpu.dynamic_rotate %84 by %c120_i32 dim 1 : vector<16x128xf32>, i32 -> vector<16x128xf32>
    %c8_i32_32 = arith.constant 8 : i32
    %87 = tpu.dynamic_rotate %54 by %c8_i32_32 dim 1 : vector<1x128xi32>, i32 -> vector<1x128xi32>
    %c8_i32_33 = arith.constant 8 : i32
    %88 = vector.broadcast %c8_i32_33 : i32 to vector<1x128xi32>
    %89 = arith.xori %54, %88 : vector<1x128xi32>
    %90 = arith.cmpi eq, %87, %89 : vector<1x128xi32>
    %91 = vector.shape_cast %90 : vector<1x128xi1> to vector<1x128xi1>
    %92 = vector.broadcast %91 : vector<1x128xi1> to vector<16x128xi1>
    %93 = arith.select %92, %85, %86 : vector<16x128xi1>, vector<16x128xf32>
    %94 = arith.addf %84, %93 : vector<16x128xf32>
    %cst_34 = arith.constant 1.000000e-30 : f32
    %95 = vector.broadcast %cst_34 : f32 to vector<16x128xf32>
    %96 = arith.maximumf %94, %95 : vector<16x128xf32>
    %97 = arith.divf %53, %96 : vector<16x128xf32>
    %c0_35 = arith.constant 0 : index
    %c0_36 = arith.constant 0 : index
    %98 = vector.load %arg8[%c0_35, %c0_36] : memref<16x128xf32, #tpu.memory_space<vmem>>, vector<16x128xf32>
    tpu.vector_store %arg8[%c0_35, %c0_36], %97 {strides = array<i32>} : memref<16x128xf32, #tpu.memory_space<vmem>>, vector<16x128xf32>,
    return
  }
  func.func @transform_0(%arg0: i32) -> (i32, i32) {
    %c0_i32 = arith.constant 0 : i32
    %c0_i32_0 = arith.constant 0 : i32
    return %arg0, %c0_i32 : i32, i32
  }
  func.func @transform_1(%arg0: i32) -> (i32, i32) {
    %c0_i32 = arith.constant 0 : i32
    %c0_i32_0 = arith.constant 0 : i32
    %c0_i32_1 = arith.constant 0 : i32
    return %c0_i32, %c0_i32_0 : i32, i32
  }
  func.func @transform_2(%arg0: i32) -> (i32, i32) {
    %c0_i32 = arith.constant 0 : i32
    %c0_i32_0 = arith.constant 0 : i32
    %c0_i32_1 = arith.constant 0 : i32
    return %c0_i32, %c0_i32_0 : i32, i32
  }
  func.func @transform_3(%arg0: i32) -> (i32, i32) {
    %c0_i32 = arith.constant 0 : i32
    %c0_i32_0 = arith.constant 0 : i32
    %c0_i32_1 = arith.constant 0 : i32
    return %c0_i32, %c0_i32_0 : i32, i32
  }
  func.func @transform_4(%arg0: i32) -> (i32, i32) {
    %c0_i32 = arith.constant 0 : i32
    %c0_i32_0 = arith.constant 0 : i32
    %c0_i32_1 = arith.constant 0 : i32
    return %c0_i32, %c0_i32_0 : i32, i32
  }
  func.func @transform_5(%arg0: i32) -> (i32, i32) {
    %c0_i32 = arith.constant 0 : i32
    %c0_i32_0 = arith.constant 0 : i32
    %c0_i32_1 = arith.constant 0 : i32
    return %c0_i32, %c0_i32_0 : i32, i32
  }
  func.func @transform_6(%arg0: i32) -> (i32, i32) {
    %c0_i32 = arith.constant 0 : i32
    %c0_i32_0 = arith.constant 0 : i32
    %c0_i32_1 = arith.constant 0 : i32
    return %c0_i32, %c0_i32_0 : i32, i32
  }
  func.func @transform_7(%arg0: i32) -> (i32, i32) {
    %c0_i32 = arith.constant 0 : i32
    %c0_i32_0 = arith.constant 0 : i32
    return %arg0, %c0_i32 : i32, i32
  }
}

</mosaic_0001>

<bundles_post_ra>
// kernel: mlp_action_forward.1
= control target key start
LH: loop header
LB: loop body
LE: loop exit
PB: predicated region body
PF: predicated region fallthrough
CT: control target
= control target key end

     0   :  { %s953_s24 = smov 0   ;;  %s1070_s0 = inlined_call_operand.vmem [shape: f32[48,8], index: 0, kind: input, shape index: {}]   ;;  %s1071_s1 = inlined_call_operand.vmem [shape: bf16[8,32], index: 1, kind: input, shape index: {}]   ;;  %s1072_s2 = inlined_call_operand.vmem [shape: bf16[32,32], index: 2, kind: input, shape index: {}]   ;;  %s1073_s3 = inlined_call_operand.vmem [shape: bf16[32,32], index: 3, kind: input, shape index: {}]   ;;  %s1074_s4 = inlined_call_operand.vmem [shape: bf16[32,32], index: 4, kind: input, shape index: {}]   ;;  %s1075_s5 = inlined_call_operand.vmem [shape: bf16[32,128], index: 5, kind: input, shape index: {}]   ;;  %s1076_s6 = inlined_call_operand.vmem [shape: f32[5,128], index: 6, kind: input, shape index: {}]   ;;  %s1077_s7 = inlined_call_operand.vmem [shape: f32[48,128], index: 7, kind: output, shape index: {}]  }
   0x1 LB: > { %s778_s25 = sadd.s32 4294967295, %s900_s24   ;;  %p782_p0 = scmp.ge.s32.totalorder %s900_s24, 1  ;;  %s900_s24 = sphi %s953_s24, %s17_s24  }
   0x2   : > { %p238_p1 = scmp.lt.s32.totalorder %s900_s24, 4 }
   0x4   : > { %p239_p2 = pnand %p782_p0, %p238_p1 }
   0x5   : > { %v286_v0 = vld [vmem:[%s1071_s1] sm:$0xf] (!%p239_p2)  ;;  %vm296_vm0 = vcmask (!%p239_p2), 1043456   ;;  %s783_s28 = sshll.u32 (!%p239_p2), %s778_s25, 1  ;;  %v902_v1 = vmov (!%p239_p2), 0.0   ;;  %vm903_vm1 = vmmov (!%p239_p2), 0   ;;  %v624_v61 = vlaneseq (!%p239_p2) }
   0x6   : > { %242 = sbr.rel (%p239_p2) target bundleno = 1766 (0x6e6), region = 48  ;;  %821 = vmatprep.subr.bf16.mxu0 (!%p239_p2), %v902_v1  ;;  %v298_v2 = vsel (!%p239_p2), %vm296_vm0, %v286_v0, 0  ;;  %823 = vmatprep.mubr.msk.bf16.mxu0 (!%p239_p2), %vm903_vm1, %v902_v1  ;;  %p271_p3 = scmp.lt.s32.totalorder (!%p239_p2), %s783_s28, 5  ;;  %vm292_vm2 = vcmask (!%p239_p2), 64512   ;;  %v878_v6 = vld [vmem:[%s1072_s2] sm:$0xff] (!%p239_p2)   ;;  %v879_v7 = vld [vmem:[%s1072_s2 + $0x8] sm:$0xff] (!%p239_p2)  }
   0x7   : > { %822 = vmatpush3.bf16.msra.mxu0 (!%p239_p2), %v298_v2  ;;  %827 = vmatprep.subr.bf16.mxu1 (!%p239_p2), %v902_v1  ;;  %v787_v8 = vld [vmem:[%s1076_s6] ss:$0 sm:$0xff] (!%p239_p2)  ;;  %vm365_vm3 = vcmask (!%p239_p2), 261120   ;;  %v881_v19 = vld [vmem:[%s1073_s3 + $0x8] sm:$0xff] (!%p239_p2)   ;;  %v789_v20 = vld [vmem:[%s1076_s6 + $0x1] ss:$0 sm:$0xff] (!%p239_p2) }
   0x8   : > { %831 = vmatprep.mubr.msk.bf16.mxu1 (!%p239_p2), %vm903_vm1, %v902_v1  ;;  %835 = vmatprep.subr.bf16.mxu0 (!%p239_p2), %v902_v1  ;;  %v880_v18 = vld [vmem:[%s1073_s3] sm:$0xff] (!%p239_p2)   ;;  %v883_v31 = vld [vmem:[%s1074_s4 + $0x8] sm:$0xff] (!%p239_p2)   ;;  %v1034_v62 = vand.u32 (!%p239_p2), 127, %v624_v61  ;;  %s904_s16 = smov (!%p239_p2), 1   ;;  %s905_s17 = smov (!%p239_p2), 127  }
   0x9   : > { %828 = vmatpush3.bf16.msra.mxu1 (!%p239_p2), %v878_v6  ;;  %v882_v30 = vld [vmem:[%s1074_s4] sm:$0xff] (!%p239_p2)   ;;  %v885_v43 = vld [vmem:[%s1075_s5 + $0x8] sm:$0xff] (!%p239_p2)   ;;  %s906_s18 = smov (!%p239_p2), 2   ;;  %s908_s19 = smov (!%p239_p2), 126  }
   0xa   : > { %829 = vmatprep.subr.bf16.mxu1 (!%p239_p2), %v902_v1  ;;  %v793_v32 = vld [vmem:[%s1076_s6 + $0x2] ss:$0 sm:$0xff] (!%p239_p2)  ;;  %v797_v44 = vld [vmem:[%s1076_s6 + $0x3] ss:$0 sm:$0xff] (!%p239_p2)  ;;  %v801_v54 = vld [vmem:[%s1076_s6 + $0x4] ss:$0 sm:$0xff] (!%p239_p2)  ;;  %634 = vrot.lane.b32.xlu1 (!%p239_p2), %v1034_v62, %s904_s16 }
   0xb   : > { %v884_v42 = vld [vmem:[%s1075_s5] sm:$0xff] (!%p239_p2)   ;;  %s909_s20 = smov (!%p239_p2), 4   ;;  %s910_s21 = smov (!%p239_p2), 124  }
   0xc   : > { %s911_s22 = smov (!%p239_p2), 8   ;;  %s912_s23 = smov (!%p239_p2), 120  }
   0xd   : > { %s1079_s28 = smov (!%p271_p3, %s783_s28), 5  ;;  %830 = vmatpush3.bf16.msra.mxu1 %v879_v7  ;;  %v636_v7 = vxor.u32 1, %v1034_v62 }
   0xe   : > { %s784_s29 = sshll.u32 %s1079_s28, 3  ;;  %843 = vmatprep.subr.bf16.mxu1 %v902_v1 }
   0xf   : > { %s274_s9 = scalar_lea.vmem %s1070_s0, %s784_s29  ;;  %s280_s27 = scalar_lea.vmem %s1077_s7, %s784_s29 }
  0x10   : > { %v283_v3 = vld [vmem:[%s274_s9] sm:$0xff]  ;;  %v284_v4 = vld [vmem:[%s274_s9 + $0x8] sm:$0xff] }
  0x11   : > { %v285_v5 = vpack.c.bf16 %v284_v4, %v283_v3 }
  0x13   : > { %824 = vmatmul.mubr.msk.bf16.vlgmr.msra.gmra.mrb[0].mxu0 %vm292_vm2, %v285_v5 }
  0x14   : > { %839 = vmatprep.mubr.msk.bf16.mxu0 %vm903_vm1, %v902_v1  ;;  %836 = vmatpush3.bf16.msra.mxu0 %v880_v18 }
  0x15   : > { %837 = vmatprep.subr.bf16.mxu0 %v902_v1 }
  0x18   : > { %838 = vmatpush3.bf16.msra.mxu0 %v881_v19 }
  0x19   : > { %851 = vmatprep.subr.bf16.mxu0 %v902_v1 }
  0xe6   : > { %v334_v9 = vpop.f32.mrb[0].mxu0 }
  0xe7   : > { %v335_v10 = vadd.f32 %v787_v8, %v334_v9  ;;  %v825_v11 = vpop.f32.mrb[1].mxu0  ;;  %v640_v9 = vshrl.u32 %v624_v61, 7 }
  0xe8   : > { %v337_v12 = vpop.f32.mrb[2].mxu0  ;;  %v907_v11 = vmov 0  }
  0xe9   : > { %v338_v13 = vadd.f32 %v787_v8, %v337_v12  ;;  %v826_v14 = vpop.f32.mrb[3].mxu0  ;;  %v341_v15 = vmax.f32 %v335_v10, 0.0  ;;  %v635_v8 = vpop.permute.xlu1 %634  ;;  %v1047_v10 = vsub.s32 0, %v640_v9 }
  0xea   : > { %vm637_vm4 = vcmp.eq.s32.totalorder %v635_v8, %v636_v7 }
  0xeb   : > { %v342_v16 = vmax.f32 %v338_v13, 0.0  ;;  %v638_v12 = vsel %vm637_vm4, 1, %v907_v11 }
  0xec   : > { %v642_v13 = vrot.slane %v638_v12, %v1047_v10 }
  0xed   : > { %v343_v17 = vpack.c.bf16 %v342_v16, %v341_v15 }
  0xee   : > { %vm643_vm5 = vcmp.eq.s32.totalorder %v642_v13, 1 }
  0xef   : > { %832 = vmatmul.mubr.msk.bf16.vlgmr.msra.gmra.mrb[0].mxu1 %vm365_vm3, %v343_v17 }
  0xf0   : > { %847 = vmatprep.mubr.msk.bf16.mxu1 %vm903_vm1, %v902_v1  ;;  %844 = vmatpush3.bf16.msra.mxu1 %v882_v30 }
  0xf1   : > { %845 = vmatprep.subr.bf16.mxu1 %v902_v1 }
  0xf4   : > { %846 = vmatpush3.bf16.msra.mxu1 %v883_v31 }
 0x1c2   : > { %v403_v21 = vpop.f32.mrb[0].mxu1 }
 0x1c3   : > { %v404_v22 = vadd.f32 %v789_v20, %v403_v21  ;;  %v833_v23 = vpop.f32.mrb[1].mxu1 }
 0x1c4   : > { %v406_v24 = vpop.f32.mrb[2].mxu1 }
 0x1c5   : > { %v407_v25 = vadd.f32 %v789_v20, %v406_v24  ;;  %v834_v26 = vpop.f32.mrb[3].mxu1  ;;  %v410_v27 = vmax.f32 %v404_v22, 0.0  ;;  %v658_v22 = vxor.u32 2, %v1034_v62 }
 0x1c7   : > { %v411_v28 = vmax.f32 %v407_v25, 0.0 }
 0x1c9   : > { %v412_v29 = vpack.c.bf16 %v411_v28, %v410_v27 }
 0x1cb   : > { %840 = vmatmul.mubr.msk.bf16.vlgmr.msra.gmra.mrb[4].mxu0 %vm365_vm3, %v412_v29 }
 0x1cc   : > { %855 = vmatprep.mubr.msk.bf16.mxu0 %vm903_vm1, %v902_v1  ;;  %852 = vmatpush3.bf16.msra.mxu0 %v884_v42 }
 0x1cd   : > { %853 = vmatprep.subr.bf16.mxu0 %v902_v1 }
 0x1d0   : > { %854 = vmatpush3.bf16.msra.mxu0 %v885_v43 }
 0x29e   : > { %v471_v33 = vpop.f32.mrb[4].mxu0 }
 0x29f   : > { %v472_v34 = vadd.f32 %v793_v32, %v471_v33  ;;  %v841_v35 = vpop.f32.mrb[5].mxu0 }
 0x2a0   : > { %v474_v36 = vpop.f32.mrb[6].mxu0 }
 0x2a1   : > { %v475_v37 = vadd.f32 %v793_v32, %v474_v36  ;;  %v842_v38 = vpop.f32.mrb[7].mxu0  ;;  %v478_v39 = vmax.f32 %v472_v34, 0.0  ;;  %v680_v34 = vxor.u32 4, %v1034_v62 }
 0x2a3   : > { %v479_v40 = vmax.f32 %v475_v37, 0.0 }
 0x2a5   : > { %v480_v41 = vpack.c.bf16 %v479_v40, %v478_v39 }
 0x2a7   : > { %848 = vmatmul.mubr.msk.bf16.vlgmr.msra.gmra.mrb[4].mxu1 %vm365_vm3, %v480_v41 }
 0x37a   : > { %v539_v45 = vpop.f32.mrb[4].mxu1 }
 0x37b   : > { %v540_v46 = vadd.f32 %v797_v44, %v539_v45  ;;  %v849_v47 = vpop.f32.mrb[5].mxu1 }
 0x37c   : > { %v542_v48 = vpop.f32.mrb[6].mxu1 }
 0x37d   : > { %v543_v49 = vadd.f32 %v797_v44, %v542_v48  ;;  %v850_v50 = vpop.f32.mrb[7].mxu1  ;;  %v546_v51 = vmax.f32 %v540_v46, 0.0  ;;  %v702_v46 = vxor.u32 8, %v1034_v62 }
 0x37f   : > { %v547_v52 = vmax.f32 %v543_v49, 0.0 }
 0x381   : > { %v548_v53 = vpack.c.bf16 %v547_v52, %v546_v51 }
 0x383   : > { %856 = vmatmul.mubr.msk.bf16.vlgmr.msra.gmra.mrb[8].mxu0 %vm365_vm3, %v548_v53 }
 0x456   : > { %v607_v55 = vpop.f32.mrb[8].mxu0 }
 0x457   : > { %v608_v56 = vadd.f32 %v801_v54, %v607_v55  ;;  %v857_v57 = vpop.f32.mrb[9].mxu0 }
 0x458   : > { %v610_v58 = vpop.f32.mrb[10].mxu0 }
 0x459   : > { %614 = vmax.xlane.f32.xlu0 %v608_v56  ;;  %v858_v59 = vpop.f32.mrb[11].mxu0  ;;  %v611_v60 = vadd.f32 %v801_v54, %v610_v58 }
 0x45d   : > { %616 = vmax.xlane.f32.xlu0 %v611_v60 }
 0x4e6   : > { %v615_v63 = vpop.xlane.xlu0 %614 }
 0x4e7   : > { %v618_v0 = vsub.f32 %v608_v56, %v615_v63 }
 0x4e9   : > { %v620_v1 = vmul.f32 1.442695, %v618_v0 }
 0x4ea   : > { %v617_v2 = vpop.xlane.xlu0 %616 }
 0x4eb   : > { %886 = vpow2.f32 %v620_v1  ;;  %v619_v3 = vsub.f32 %v611_v60, %v617_v2 }
 0x4ed   : > { %v622_v4 = vmul.f32 1.442695, %v619_v3 }
 0x4ef   : > { %888 = vpow2.f32 %v622_v4 }
 0x4f5   : > { %v1037_v5 = vpop.eup %886 }
 0x4f6   : > { %626 = vrot.lane.b32.xlu1 %v1037_v5, %s904_s16  ;;  %630 = vrot.lane.b32.xlu0 %v1037_v5, %s905_s17 }
 0x4f9   : > { %v1041_v6 = vpop.eup %888 }
 0x4fa   : > { %628 = vrot.lane.b32.xlu1 %v1041_v6, %s904_s16 }
 0x4fe   : > { %632 = vrot.lane.b32.xlu1 %v1041_v6, %s905_s17 }
 0x502   : > { %656 = vrot.lane.b32.xlu1 %v1034_v62, %s906_s18 }
 0x568   : > { %v627_v14 = vpop.permute.xlu1 %626  ;;  %v631_v15 = vpop.permute.xlu0 %630 }
 0x569   : > { %v644_v16 = vsel %vm643_vm5, %v627_v14, %v631_v15 }
 0x56a   : > { %v646_v17 = vadd.f32 %v1037_v5, %v644_v16 }
 0x56c   : > { %v629_v18 = vpop.permute.xlu1 %628  ;;  %648 = vrot.lane.b32.xlu1 %v646_v17, %s906_s18 }
 0x570   : > { %v633_v19 = vpop.permute.xlu1 %632  ;;  %652 = vrot.lane.b32.xlu1 %v646_v17, %s908_s19 }
 0x571   : > { %v645_v20 = vsel %vm643_vm5, %v629_v18, %v633_v19 }
 0x572   : > { %v647_v21 = vadd.f32 %v1041_v6, %v645_v20 }
 0x574   : > { %654 = vrot.lane.b32.xlu0 %v647_v21, %s908_s19  ;;  %650 = vrot.lane.b32.xlu1 %v647_v21, %s906_s18  ;;  %v657_v23 = vpop.permute.xlu1 %656 }
 0x575   : > { %vm659_vm6 = vcmp.eq.s32.totalorder %v657_v23, %v658_v22 }
 0x576   : > { %v660_v24 = vsel %vm659_vm6, 1, %v907_v11 }
 0x577   : > { %v664_v25 = vrot.slane %v660_v24, %v1047_v10 }
 0x578   : > { %678 = vrot.lane.b32.xlu1 %v1034_v62, %s909_s20 }
 0x579   : > { %vm665_vm7 = vcmp.eq.s32.totalorder %v664_v25, 1 }
 0x5de   : > { %v649_v26 = vpop.permute.xlu1 %648 }
 0x5e2   : > { %v653_v27 = vpop.permute.xlu1 %652 }
 0x5e3   : > { %v666_v28 = vsel %vm665_vm7, %v649_v26, %v653_v27 }
 0x5e4   : > { %v668_v29 = vadd.f32 %v666_v28, %v646_v17 }
 0x5e6   : > { %674 = vrot.lane.b32.xlu1 %v668_v29, %s910_s21  ;;  %670 = vrot.lane.b32.xlu0 %v668_v29, %s909_s20  ;;  %v651_v30 = vpop.permute.xlu1 %650  ;;  %v655_v31 = vpop.permute.xlu0 %654 }
 0x5e7   : > { %v667_v32 = vsel %vm665_vm7, %v651_v30, %v655_v31 }
 0x5e8   : > { %v669_v33 = vadd.f32 %v667_v32, %v647_v21 }
 0x5ea   : > { %676 = vrot.lane.b32.xlu1 %v669_v33, %s910_s21  ;;  %672 = vrot.lane.b32.xlu0 %v669_v33, %s909_s20  ;;  %v679_v35 = vpop.permute.xlu1 %678 }
 0x5eb   : > { %vm681_vm8 = vcmp.eq.s32.totalorder %v679_v35, %v680_v34 }
 0x5ec   : > { %v682_v36 = vsel %vm681_vm8, 1, %v907_v11 }
 0x5ed   : > { %v686_v37 = vrot.slane %v682_v36, %v1047_v10 }
 0x5ee   : > { %700 = vrot.lane.b32.xlu0 %v1034_v62, %s911_s22 }
 0x5ef   : > { %vm687_vm9 = vcmp.eq.s32.totalorder %v686_v37, 1 }
 0x658   : > { %v675_v38 = vpop.permute.xlu1 %674  ;;  %v671_v39 = vpop.permute.xlu0 %670 }
 0x659   : > { %v688_v40 = vsel %vm687_vm9, %v671_v39, %v675_v38 }
 0x65a   : > { %v690_v41 = vadd.f32 %v688_v40, %v668_v29 }
 0x65c   : > { %v677_v42 = vpop.permute.xlu1 %676  ;;  %696 = vrot.lane.b32.xlu0 %v690_v41, %s912_s23  ;;  %692 = vrot.lane.b32.xlu1 %v690_v41, %s911_s22  ;;  %v673_v43 = vpop.permute.xlu0 %672 }
 0x65d   : > { %v689_v44 = vsel %vm687_vm9, %v673_v43, %v677_v42 }
 0x65e   : > { %v691_v45 = vadd.f32 %v689_v44, %v669_v33 }
 0x660   : > { %698 = vrot.lane.b32.xlu0 %v691_v45, %s912_s23  ;;  %694 = vrot.lane.b32.xlu1 %v691_v45, %s911_s22  ;;  %v701_v47 = vpop.permute.xlu0 %700 }
 0x661   : > { %vm703_vm10 = vcmp.eq.s32.totalorder %v701_v47, %v702_v46 }
 0x662   : > { %v704_v48 = vsel %vm703_vm10, 1, %v907_v11 }
 0x663   : > { %v708_v49 = vrot.slane %v704_v48, %v1047_v10 }
 0x665   : > { %vm709_vm11 = vcmp.eq.s32.totalorder %v708_v49, 1 }
 0x6ce   : > { %v693_v50 = vpop.permute.xlu1 %692  ;;  %v697_v51 = vpop.permute.xlu0 %696 }
 0x6cf   : > { %v710_v52 = vsel %vm709_vm11, %v693_v50, %v697_v51 }
 0x6d0   : > { %v712_v53 = vadd.f32 %v710_v52, %v690_v41 }
 0x6d2   : > { %v714_v54 = vmax.f32 %v712_v53, 1e-30  ;;  %v695_v55 = vpop.permute.xlu1 %694  ;;  %v699_v56 = vpop.permute.xlu0 %698 }
 0x6d3   : > { %v711_v57 = vsel %vm709_vm11, %v695_v55, %v699_v56 }
 0x6d4   : > { %890 = vrcp.f32 %v714_v54  ;;  %v713_v58 = vadd.f32 %v711_v57, %v691_v45 }
 0x6d6   : > { %v715_v59 = vmax.f32 %v713_v58, 1e-30 }
 0x6d8   : > { %892 = vrcp.f32 %v715_v59 }
 0x6de   : > { %v891_v60 = vpop.eup %890 }
 0x6df   : > { %v717_v61 = vmul.f32 %v891_v60, %v1037_v5 }
 0x6e1   : > { %720 = vst [vmem:[%s280_s27] sm:$0xff] %v717_v61 }
 0x6e2   : > { %v893_v62 = vpop.eup %892 }
 0x6e3   : > { %v719_v63 = vmul.f32 %v893_v62, %v1041_v6 }
 0x6e5   : > { %721 = vst [vmem:[%s280_s27 + $0x8] sm:$0xff] %v719_v63 }
 0x6e6 PF: > { %s17_s24 = sadd.s32 1, %s900_s24  }
 0x6e7   : > { %p14_p4 = scmp.ge.s32.totalorder %s17_s24, 5  }
 0x6e9   :  { %16 = sbr.rel (!%p14_p4) target bundleno = 1 (0x1), region = 78 }

</bundles_post_ra>
